<compile_context>
chip_gen: v7x
topology: tpu7x:2x2x1
jax: 0.10.0
libtpu: 0.0.40
codegen_flags: <defaults>
</compile_context>

<pallas_src>
import functools

import jax
import jax.numpy as jnp
from jax.experimental import pallas as pl
from jax.experimental.pallas import tpu as pltpu

# Layer widths of RegressionNN
LAYER_DIMS = [256, 256, 128, 128, 64, 32, 32, 16, 8, 1]

LANE = 128
DEFAULT_BATCH_TILE = 1024  # sweepable 1024-2048; 1024 keeps per-step VMEM ~6 MiB


def _round_up(n, m):
    return ((n + m - 1) // m) * m


def _cdiv(a, b):
    return -(-a // b)


def _choose_batch_tile(B, batch_tile):
    """Static (trace-time) batch-tile choice.

    * Small batches: shrink tile to round_up(B, 8) instead of padding up to a
      full tile (avoids pushing hundreds of dead rows through 10 matmuls).
    * Medium batches that would otherwise be a single tile: split into >=2 tiles
      so dimension_semantics=('parallel',) can shard across v7x's 2 TensorCores.
    """
    tb = min(batch_tile, _round_up(B, 8))
    if B >= 16 and _cdiv(B, tb) < 2:
        tb = max(8, _round_up(_cdiv(B, 2), 8))
    return tb


def _mlp_kernel(*refs):
    """refs = (x_ref, w1, b1, ..., w10, b10, out_ref).

    x_ref:   (TB, F_pad)       f32, one batch tile
    w_i:     (in_pad, out_pad) bf16, zero-padded to lane multiples (VMEM-resident)
    b_i:     (1, out_pad)      f32
    out_ref: (TB, 128)         f32, lane-dense final slab (col 0 = real output)
    """
    x_ref = refs[0]
    out_ref = refs[-1]
    params = refs[1:-1]
    n_layers = len(params) // 2

    h = x_ref[...]                               # f32 (TB, F_pad)
    for i in range(n_layers):
        w = params[2 * i][...]                   # bf16 (in_pad, out_pad)
        b = params[2 * i + 1][...]               # f32  (1, out_pad)
        # bf16 operands, f32 MXU accumulation; bias add stays on the f32 VPU path.
        h = jnp.dot(h.astype(jnp.bfloat16), w,
                    preferred_element_type=jnp.float32) + b
        if i < n_layers - 1:
            h = jnp.maximum(h, 0.0)              # ReLU on all but last layer (f32)
    out_ref[...] = h.astype(out_ref.dtype)


@functools.partial(jax.jit, static_argnames=("batch_tile",))
def regression_nn_forward(x, weights, biases, *, batch_tile=DEFAULT_BATCH_TILE):
    """x: (B, num_features) f32. weights[i]: (in_i, out_i). biases[i]: (1, out_i)."""
    B, F = x.shape
    out_dim = weights[-1].shape[1]

    TB = _choose_batch_tile(B, batch_tile)
    F_pad = _round_up(F, LANE)
    B_pad = _round_up(B, TB)

    # ---- input padding (skipped entirely when already aligned) --------------
    x = x.astype(jnp.float32)
    if (B_pad, F_pad) != (B, F):
        x_p = jnp.zeros((B_pad, F_pad), jnp.float32).at[:B, :F].set(x)
    else:
        x_p = x

    # ---- pad params to lane multiples; weights -> bf16, biases stay f32 -----
    flat_params = []
    in_pad = F_pad
    for w, b in zip(weights, biases):
        in_dim, o_dim = w.shape
        out_pad = _round_up(o_dim, LANE)
        w_p = (jnp.zeros((in_pad, out_pad), jnp.float32)
               .at[:in_dim, :o_dim].set(w)
               .astype(jnp.bfloat16))
        b_p = jnp.zeros((1, out_pad), jnp.float32).at[:, :o_dim].set(b)
        flat_params.append(w_p)
        flat_params.append(b_p)
        in_pad = out_pad
    final_pad = in_pad  # padded width of last layer output (= 128)

    n_tiles = B_pad // TB

    # x / out stream over the batch grid; params use constant block indices so
    # they stay resident in VMEM across grid steps.
    in_specs = [pl.BlockSpec((TB, F_pad), lambda i: (i, 0))]
    for p in flat_params:
        in_specs.append(pl.BlockSpec(p.shape, lambda i: (0, 0)))
    out_spec = pl.BlockSpec((TB, final_pad), lambda i: (i, 0))

    out_p = pl.pallas_call(
        _mlp_kernel,
        out_shape=jax.ShapeDtypeStruct((B_pad, final_pad), jnp.float32),
        grid_spec=pl.GridSpec(
            grid=(n_tiles,),
            in_specs=in_specs,
            out_specs=out_spec,
        ),
        compiler_params=pltpu.CompilerParams(
            dimension_semantics=("parallel",),   # megacore sharding on v7x
            vmem_limit_bytes=32 * 1024 * 1024,
        ),
    )(x_p, *flat_params)

    # Lane-dense slab -> (B, 1) result (layout plumbing in the wrapper).
    return out_p[:B, :out_dim]


def init_params(key, num_features):
    """Deterministic init mimicking PyTorch nn.Linear default U[-1/sqrt(in), 1/sqrt(in)]."""
    weights, biases = [], []
    in_dim = num_features
    for out_dim in LAYER_DIMS:
        key, kw, kb = jax.random.split(key, 3)
        bound = 1.0 / (in_dim ** 0.5)
        w = jax.random.uniform(kw, (in_dim, out_dim), jnp.float32, -bound, bound)
        b = jax.random.uniform(kb, (1, out_dim), jnp.float32, -bound, bound)
        weights.append(w)
        biases.append(b)
        in_dim = out_dim
    return weights, biases


def reference_forward(x, weights, biases, *, dot_dtype=jnp.float32):
    """Pure-JAX reference; dot_dtype=bfloat16 mimics the kernel's MXU operand dtype."""
    h = x.astype(jnp.float32)
    for i, (w, b) in enumerate(zip(weights, biases)):
        h = jnp.dot(h.astype(dot_dtype), w.astype(dot_dtype),
                    preferred_element_type=jnp.float32) + b
        if i < len(weights) - 1:
            h = jnp.maximum(h, 0.0)
    return h


if __name__ == "__main__":
    key = jax.random.PRNGKey(0)
    num_features = 32
    batch = 8

    key, kx = jax.random.split(key)
    x = jax.random.normal(kx, (batch, num_features), jnp.float32)
    weights, biases = init_params(key, num_features)

    # Small batch: adaptive small tile (TB=8), single grid step.
    out = jax.block_until_ready(regression_nn_forward(x, weights, biases))
    assert out.shape == (batch, 1), out.shape
    ref_bf16 = reference_forward(x, weights, biases, dot_dtype=jnp.bfloat16)
    assert jnp.allclose(out, ref_bf16, atol=1e-2, rtol=1e-2), (out, ref_bf16)
    ref_f32 = reference_forward(x, weights, biases)
    assert jnp.allclose(out, ref_f32, atol=1e-1, rtol=1e-1), (out, ref_f32)

    # Larger ragged batch: multiple grid tiles + batch/feature padding path.
    key, kx2 = jax.random.split(key)
    x2 = jax.random.normal(kx2, (1037, num_features), jnp.float32)
    out2 = jax.block_until_ready(regression_nn_forward(x2, weights, biases))
    assert out2.shape == (1037, 1), out2.shape
    ref2 = reference_forward(x2, weights, biases, dot_dtype=jnp.bfloat16)
    assert jnp.allclose(out2, ref2, atol=1e-2, rtol=1e-2)

    print("KERNEL_OK")
</pallas_src>

<mosaic_0001>
module attributes {stable_mosaic.version = 11 : i64} {
  func.func @_mlp_kernel(%arg0: i32, %arg1: memref<8x128xf32, #tpu.memory_space<vmem>>, %arg2: memref<128x256xbf16, #tpu.memory_space<vmem>>, %arg3: memref<1x256xf32, #tpu.memory_space<vmem>>, %arg4: memref<256x256xbf16, #tpu.memory_space<vmem>>, %arg5: memref<1x256xf32, #tpu.memory_space<vmem>>, %arg6: memref<256x128xbf16, #tpu.memory_space<vmem>>, %arg7: memref<1x128xf32, #tpu.memory_space<vmem>>, %arg8: memref<128x128xbf16, #tpu.memory_space<vmem>>, %arg9: memref<1x128xf32, #tpu.memory_space<vmem>>, %arg10: memref<128x128xbf16, #tpu.memory_space<vmem>>, %arg11: memref<1x128xf32, #tpu.memory_space<vmem>>, %arg12: memref<128x128xbf16, #tpu.memory_space<vmem>>, %arg13: memref<1x128xf32, #tpu.memory_space<vmem>>, %arg14: memref<128x128xbf16, #tpu.memory_space<vmem>>, %arg15: memref<1x128xf32, #tpu.memory_space<vmem>>, %arg16: memref<128x128xbf16, #tpu.memory_space<vmem>>, %arg17: memref<1x128xf32, #tpu.memory_space<vmem>>, %arg18: memref<128x128xbf16, #tpu.memory_space<vmem>>, %arg19: memref<1x128xf32, #tpu.memory_space<vmem>>, %arg20: memref<128x128xbf16, #tpu.memory_space<vmem>>, %arg21: memref<1x128xf32, #tpu.memory_space<vmem>>, %arg22: memref<8x128xf32, #tpu.memory_space<vmem>>) attributes {dimension_semantics = [#tpu.dimension_semantics<parallel>], iteration_bounds = array<i64: 1>, scalar_prefetch = 0 : i64, scratch_operands = 0 : i64, tpu.core_type = #tpu.core_type<tc>, window_params = [{transform_indices = @transform_0, window_bounds = array<i64: 8, 128>}, {pipeline_mode = #tpu.pipeline_mode<synchronous>, transform_indices = @transform_1, window_bounds = array<i64: 128, 256>}, {pipeline_mode = #tpu.pipeline_mode<synchronous>, transform_indices = @transform_2, window_bounds = array<i64: 1, 256>}, {pipeline_mode = #tpu.pipeline_mode<synchronous>, transform_indices = @transform_3, window_bounds = array<i64: 256, 256>}, {pipeline_mode = #tpu.pipeline_mode<synchronous>, transform_indices = @transform_4, window_bounds = array<i64: 1, 256>}, {pipeline_mode = #tpu.pipeline_mode<synchronous>, transform_indices = @transform_5, window_bounds = array<i64: 256, 128>}, {pipeline_mode = #tpu.pipeline_mode<synchronous>, transform_indices = @transform_6, window_bounds = array<i64: 1, 128>}, {pipeline_mode = #tpu.pipeline_mode<synchronous>, transform_indices = @transform_7, window_bounds = array<i64: 128, 128>}, {pipeline_mode = #tpu.pipeline_mode<synchronous>, transform_indices = @transform_8, window_bounds = array<i64: 1, 128>}, {pipeline_mode = #tpu.pipeline_mode<synchronous>, transform_indices = @transform_9, window_bounds = array<i64: 128, 128>}, {pipeline_mode = #tpu.pipeline_mode<synchronous>, transform_indices = @transform_10, window_bounds = array<i64: 1, 128>}, {pipeline_mode = #tpu.pipeline_mode<synchronous>, transform_indices = @transform_11, window_bounds = array<i64: 128, 128>}, {pipeline_mode = #tpu.pipeline_mode<synchronous>, transform_indices = @transform_12, window_bounds = array<i64: 1, 128>}, {pipeline_mode = #tpu.pipeline_mode<synchronous>, transform_indices = @transform_13, window_bounds = array<i64: 128, 128>}, {pipeline_mode = #tpu.pipeline_mode<synchronous>, transform_indices = @transform_14, window_bounds = array<i64: 1, 128>}, {pipeline_mode = #tpu.pipeline_mode<synchronous>, transform_indices = @transform_15, window_bounds = array<i64: 128, 128>}, {pipeline_mode = #tpu.pipeline_mode<synchronous>, transform_indices = @transform_16, window_bounds = array<i64: 1, 128>}, {pipeline_mode = #tpu.pipeline_mode<synchronous>, transform_indices = @transform_17, window_bounds = array<i64: 128, 128>}, {pipeline_mode = #tpu.pipeline_mode<synchronous>, transform_indices = @transform_18, window_bounds = array<i64: 1, 128>}, {pipeline_mode = #tpu.pipeline_mode<synchronous>, transform_indices = @transform_19, window_bounds = array<i64: 128, 128>}, {pipeline_mode = #tpu.pipeline_mode<synchronous>, transform_indices = @transform_20, window_bounds = array<i64: 1, 128>}, {transform_indices = @transform_21, window_bounds = array<i64: 8, 128>}]} {
    %c0 = arith.constant 0 : index
    %c0_0 = arith.constant 0 : index
    %0 = vector.load %arg1[%c0, %c0_0] : memref<8x128xf32, #tpu.memory_space<vmem>>, vector<8x128xf32>
    %c0_1 = arith.constant 0 : index
    %c0_2 = arith.constant 0 : index
    %1 = vector.load %arg2[%c0_1, %c0_2] : memref<128x256xbf16, #tpu.memory_space<vmem>>, vector<128x256xbf16>
    %c0_3 = arith.constant 0 : index
    %c0_4 = arith.constant 0 : index
    %2 = vector.load %arg3[%c0_3, %c0_4] : memref<1x256xf32, #tpu.memory_space<vmem>>, vector<1x256xf32>
    %3 = arith.truncf %0 : vector<8x128xf32> to vector<8x128xbf16>
    %cst = arith.constant dense<0.000000e+00> : vector<8x256xf32>
    %4 = tpu.matmul %3, %1, %cst {dimension_numbers = #tpu.dot_dimension_numbers<[1], [0], [0], [1], [0, 0, 1, 1], [], []>} : vector<8x128xbf16>, vector<128x256xbf16>, vector<8x256xf32> -> vector<8x256xf32>
    %5 = vector.broadcast %2 : vector<1x256xf32> to vector<8x256xf32>
    %6 = arith.addf %4, %5 : vector<8x256xf32>
    %cst_5 = arith.constant 0.000000e+00 : f32
    %7 = vector.broadcast %cst_5 : f32 to vector<8x256xf32>
    %8 = arith.maximumf %6, %7 : vector<8x256xf32>
    %c0_6 = arith.constant 0 : index
    %c0_7 = arith.constant 0 : index
    %9 = vector.load %arg4[%c0_6, %c0_7] : memref<256x256xbf16, #tpu.memory_space<vmem>>, vector<256x256xbf16>
    %c0_8 = arith.constant 0 : index
    %c0_9 = arith.constant 0 : index
    %10 = vector.load %arg5[%c0_8, %c0_9] : memref<1x256xf32, #tpu.memory_space<vmem>>, vector<1x256xf32>
    %11 = arith.truncf %8 : vector<8x256xf32> to vector<8x256xbf16>
    %cst_10 = arith.constant dense<0.000000e+00> : vector<8x256xf32>
    %12 = tpu.matmul %11, %9, %cst_10 {dimension_numbers = #tpu.dot_dimension_numbers<[1], [0], [0], [1], [0, 0, 1, 1], [], []>} : vector<8x256xbf16>, vector<256x256xbf16>, vector<8x256xf32> -> vector<8x256xf32>
    %13 = vector.broadcast %10 : vector<1x256xf32> to vector<8x256xf32>
    %14 = arith.addf %12, %13 : vector<8x256xf32>
    %cst_11 = arith.constant 0.000000e+00 : f32
    %15 = vector.broadcast %cst_11 : f32 to vector<8x256xf32>
    %16 = arith.maximumf %14, %15 : vector<8x256xf32>
    %c0_12 = arith.constant 0 : index
    %c0_13 = arith.constant 0 : index
    %17 = vector.load %arg6[%c0_12, %c0_13] : memref<256x128xbf16, #tpu.memory_space<vmem>>, vector<256x128xbf16>
    %c0_14 = arith.constant 0 : index
    %c0_15 = arith.constant 0 : index
    %18 = vector.load %arg7[%c0_14, %c0_15] : memref<1x128xf32, #tpu.memory_space<vmem>>, vector<1x128xf32>
    %19 = arith.truncf %16 : vector<8x256xf32> to vector<8x256xbf16>
    %cst_16 = arith.constant dense<0.000000e+00> : vector<8x128xf32>
    %20 = tpu.matmul %19, %17, %cst_16 {dimension_numbers = #tpu.dot_dimension_numbers<[1], [0], [0], [1], [0, 0, 1, 1], [], []>} : vector<8x256xbf16>, vector<256x128xbf16>, vector<8x128xf32> -> vector<8x128xf32>
    %21 = vector.broadcast %18 : vector<1x128xf32> to vector<8x128xf32>
    %22 = arith.addf %20, %21 : vector<8x128xf32>
    %cst_17 = arith.constant 0.000000e+00 : f32
    %23 = vector.broadcast %cst_17 : f32 to vector<8x128xf32>
    %24 = arith.maximumf %22, %23 : vector<8x128xf32>
    %c0_18 = arith.constant 0 : index
    %c0_19 = arith.constant 0 : index
    %25 = vector.load %arg8[%c0_18, %c0_19] : memref<128x128xbf16, #tpu.memory_space<vmem>>, vector<128x128xbf16>
    %c0_20 = arith.constant 0 : index
    %c0_21 = arith.constant 0 : index
    %26 = vector.load %arg9[%c0_20, %c0_21] : memref<1x128xf32, #tpu.memory_space<vmem>>, vector<1x128xf32>
    %27 = arith.truncf %24 : vector<8x128xf32> to vector<8x128xbf16>
    %cst_22 = arith.constant dense<0.000000e+00> : vector<8x128xf32>
    %28 = tpu.matmul %27, %25, %cst_22 {dimension_numbers = #tpu.dot_dimension_numbers<[1], [0], [0], [1], [0, 0, 1, 1], [], []>} : vector<8x128xbf16>, vector<128x128xbf16>, vector<8x128xf32> -> vector<8x128xf32>
    %29 = vector.broadcast %26 : vector<1x128xf32> to vector<8x128xf32>
    %30 = arith.addf %28, %29 : vector<8x128xf32>
    %cst_23 = arith.constant 0.000000e+00 : f32
    %31 = vector.broadcast %cst_23 : f32 to vector<8x128xf32>
    %32 = arith.maximumf %30, %31 : vector<8x128xf32>
    %c0_24 = arith.constant 0 : index
    %c0_25 = arith.constant 0 : index
    %33 = vector.load %arg10[%c0_24, %c0_25] : memref<128x128xbf16, #tpu.memory_space<vmem>>, vector<128x128xbf16>
    %c0_26 = arith.constant 0 : index
    %c0_27 = arith.constant 0 : index
    %34 = vector.load %arg11[%c0_26, %c0_27] : memref<1x128xf32, #tpu.memory_space<vmem>>, vector<1x128xf32>
    %35 = arith.truncf %32 : vector<8x128xf32> to vector<8x128xbf16>
    %cst_28 = arith.constant dense<0.000000e+00> : vector<8x128xf32>
    %36 = tpu.matmul %35, %33, %cst_28 {dimension_numbers = #tpu.dot_dimension_numbers<[1], [0], [0], [1], [0, 0, 1, 1], [], []>} : vector<8x128xbf16>, vector<128x128xbf16>, vector<8x128xf32> -> vector<8x128xf32>
    %37 = vector.broadcast %34 : vector<1x128xf32> to vector<8x128xf32>
    %38 = arith.addf %36, %37 : vector<8x128xf32>
    %cst_29 = arith.constant 0.000000e+00 : f32
    %39 = vector.broadcast %cst_29 : f32 to vector<8x128xf32>
    %40 = arith.maximumf %38, %39 : vector<8x128xf32>
    %c0_30 = arith.constant 0 : index
    %c0_31 = arith.constant 0 : index
    %41 = vector.load %arg12[%c0_30, %c0_31] : memref<128x128xbf16, #tpu.memory_space<vmem>>, vector<128x128xbf16>
    %c0_32 = arith.constant 0 : index
    %c0_33 = arith.constant 0 : index
    %42 = vector.load %arg13[%c0_32, %c0_33] : memref<1x128xf32, #tpu.memory_space<vmem>>, vector<1x128xf32>
    %43 = arith.truncf %40 : vector<8x128xf32> to vector<8x128xbf16>
    %cst_34 = arith.constant dense<0.000000e+00> : vector<8x128xf32>
    %44 = tpu.matmul %43, %41, %cst_34 {dimension_numbers = #tpu.dot_dimension_numbers<[1], [0], [0], [1], [0, 0, 1, 1], [], []>} : vector<8x128xbf16>, vector<128x128xbf16>, vector<8x128xf32> -> vector<8x128xf32>
    %45 = vector.broadcast %42 : vector<1x128xf32> to vector<8x128xf32>
    %46 = arith.addf %44, %45 : vector<8x128xf32>
    %cst_35 = arith.constant 0.000000e+00 : f32
    %47 = vector.broadcast %cst_35 : f32 to vector<8x128xf32>
    %48 = arith.maximumf %46, %47 : vector<8x128xf32>
    %c0_36 = arith.constant 0 : index
    %c0_37 = arith.constant 0 : index
    %49 = vector.load %arg14[%c0_36, %c0_37] : memref<128x128xbf16, #tpu.memory_space<vmem>>, vector<128x128xbf16>
    %c0_38 = arith.constant 0 : index
    %c0_39 = arith.constant 0 : index
    %50 = vector.load %arg15[%c0_38, %c0_39] : memref<1x128xf32, #tpu.memory_space<vmem>>, vector<1x128xf32>
    %51 = arith.truncf %48 : vector<8x128xf32> to vector<8x128xbf16>
    %cst_40 = arith.constant dense<0.000000e+00> : vector<8x128xf32>
    %52 = tpu.matmul %51, %49, %cst_40 {dimension_numbers = #tpu.dot_dimension_numbers<[1], [0], [0], [1], [0, 0, 1, 1], [], []>} : vector<8x128xbf16>, vector<128x128xbf16>, vector<8x128xf32> -> vector<8x128xf32>
    %53 = vector.broadcast %50 : vector<1x128xf32> to vector<8x128xf32>
    %54 = arith.addf %52, %53 : vector<8x128xf32>
    %cst_41 = arith.constant 0.000000e+00 : f32
    %55 = vector.broadcast %cst_41 : f32 to vector<8x128xf32>
    %56 = arith.maximumf %54, %55 : vector<8x128xf32>
    %c0_42 = arith.constant 0 : index
    %c0_43 = arith.constant 0 : index
    %57 = vector.load %arg16[%c0_42, %c0_43] : memref<128x128xbf16, #tpu.memory_space<vmem>>, vector<128x128xbf16>
    %c0_44 = arith.constant 0 : index
    %c0_45 = arith.constant 0 : index
    %58 = vector.load %arg17[%c0_44, %c0_45] : memref<1x128xf32, #tpu.memory_space<vmem>>, vector<1x128xf32>
    %59 = arith.truncf %56 : vector<8x128xf32> to vector<8x128xbf16>
    %cst_46 = arith.constant dense<0.000000e+00> : vector<8x128xf32>
    %60 = tpu.matmul %59, %57, %cst_46 {dimension_numbers = #tpu.dot_dimension_numbers<[1], [0], [0], [1], [0, 0, 1, 1], [], []>} : vector<8x128xbf16>, vector<128x128xbf16>, vector<8x128xf32> -> vector<8x128xf32>
    %61 = vector.broadcast %58 : vector<1x128xf32> to vector<8x128xf32>
    %62 = arith.addf %60, %61 : vector<8x128xf32>
    %cst_47 = arith.constant 0.000000e+00 : f32
    %63 = vector.broadcast %cst_47 : f32 to vector<8x128xf32>
    %64 = arith.maximumf %62, %63 : vector<8x128xf32>
    %c0_48 = arith.constant 0 : index
    %c0_49 = arith.constant 0 : index
    %65 = vector.load %arg18[%c0_48, %c0_49] : memref<128x128xbf16, #tpu.memory_space<vmem>>, vector<128x128xbf16>
    %c0_50 = arith.constant 0 : index
    %c0_51 = arith.constant 0 : index
    %66 = vector.load %arg19[%c0_50, %c0_51] : memref<1x128xf32, #tpu.memory_space<vmem>>, vector<1x128xf32>
    %67 = arith.truncf %64 : vector<8x128xf32> to vector<8x128xbf16>
    %cst_52 = arith.constant dense<0.000000e+00> : vector<8x128xf32>
    %68 = tpu.matmul %67, %65, %cst_52 {dimension_numbers = #tpu.dot_dimension_numbers<[1], [0], [0], [1], [0, 0, 1, 1], [], []>} : vector<8x128xbf16>, vector<128x128xbf16>, vector<8x128xf32> -> vector<8x128xf32>
    %69 = vector.broadcast %66 : vector<1x128xf32> to vector<8x128xf32>
    %70 = arith.addf %68, %69 : vector<8x128xf32>
    %cst_53 = arith.constant 0.000000e+00 : f32
    %71 = vector.broadcast %cst_53 : f32 to vector<8x128xf32>
    %72 = arith.maximumf %70, %71 : vector<8x128xf32>
    %c0_54 = arith.constant 0 : index
    %c0_55 = arith.constant 0 : index
    %73 = vector.load %arg20[%c0_54, %c0_55] : memref<128x128xbf16, #tpu.memory_space<vmem>>, vector<128x128xbf16>
    %c0_56 = arith.constant 0 : index
    %c0_57 = arith.constant 0 : index
    %74 = vector.load %arg21[%c0_56, %c0_57] : memref<1x128xf32, #tpu.memory_space<vmem>>, vector<1x128xf32>
    %75 = arith.truncf %72 : vector<8x128xf32> to vector<8x128xbf16>
    %cst_58 = arith.constant dense<0.000000e+00> : vector<8x128xf32>
    %76 = tpu.matmul %75, %73, %cst_58 {dimension_numbers = #tpu.dot_dimension_numbers<[1], [0], [0], [1], [0, 0, 1, 1], [], []>} : vector<8x128xbf16>, vector<128x128xbf16>, vector<8x128xf32> -> vector<8x128xf32>
    %77 = vector.broadcast %74 : vector<1x128xf32> to vector<8x128xf32>
    %78 = arith.addf %76, %77 : vector<8x128xf32>
    %c0_59 = arith.constant 0 : index
    %c0_60 = arith.constant 0 : index
    %79 = vector.load %arg22[%c0_59, %c0_60] : memref<8x128xf32, #tpu.memory_space<vmem>>, vector<8x128xf32>
    tpu.vector_store %arg22[%c0_59, %c0_60], %78 {strides = array<i32>} : memref<8x128xf32, #tpu.memory_space<vmem>>, vector<8x128xf32>,
    return
  }
  func.func @transform_0(%arg0: i32) -> (i32, i32) {
    %c0_i32 = arith.constant 0 : i32
    %c0_i32_0 = arith.constant 0 : i32
    return %arg0, %c0_i32 : i32, i32
  }
  func.func @transform_1(%arg0: i32) -> (i32, i32) {
    %c0_i32 = arith.constant 0 : i32
    %c0_i32_0 = arith.constant 0 : i32
    %c0_i32_1 = arith.constant 0 : i32
    return %c0_i32, %c0_i32_0 : i32, i32
  }
  func.func @transform_2(%arg0: i32) -> (i32, i32) {
    %c0_i32 = arith.constant 0 : i32
    %c0_i32_0 = arith.constant 0 : i32
    %c0_i32_1 = arith.constant 0 : i32
    return %c0_i32, %c0_i32_0 : i32, i32
  }
  func.func @transform_3(%arg0: i32) -> (i32, i32) {
    %c0_i32 = arith.constant 0 : i32
    %c0_i32_0 = arith.constant 0 : i32
    %c0_i32_1 = arith.constant 0 : i32
    return %c0_i32, %c0_i32_0 : i32, i32
  }
  func.func @transform_4(%arg0: i32) -> (i32, i32) {
    %c0_i32 = arith.constant 0 : i32
    %c0_i32_0 = arith.constant 0 : i32
    %c0_i32_1 = arith.constant 0 : i32
    return %c0_i32, %c0_i32_0 : i32, i32
  }
  func.func @transform_5(%arg0: i32) -> (i32, i32) {
    %c0_i32 = arith.constant 0 : i32
    %c0_i32_0 = arith.constant 0 : i32
    %c0_i32_1 = arith.constant 0 : i32
    return %c0_i32, %c0_i32_0 : i32, i32
  }
  func.func @transform_6(%arg0: i32) -> (i32, i32) {
    %c0_i32 = arith.constant 0 : i32
    %c0_i32_0 = arith.constant 0 : i32
    %c0_i32_1 = arith.constant 0 : i32
    return %c0_i32, %c0_i32_0 : i32, i32
  }
  func.func @transform_7(%arg0: i32) -> (i32, i32) {
    %c0_i32 = arith.constant 0 : i32
    %c0_i32_0 = arith.constant 0 : i32
    %c0_i32_1 = arith.constant 0 : i32
    return %c0_i32, %c0_i32_0 : i32, i32
  }
  func.func @transform_8(%arg0: i32) -> (i32, i32) {
    %c0_i32 = arith.constant 0 : i32
    %c0_i32_0 = arith.constant 0 : i32
    %c0_i32_1 = arith.constant 0 : i32
    return %c0_i32, %c0_i32_0 : i32, i32
  }
  func.func @transform_9(%arg0: i32) -> (i32, i32) {
    %c0_i32 = arith.constant 0 : i32
    %c0_i32_0 = arith.constant 0 : i32
    %c0_i32_1 = arith.constant 0 : i32
    return %c0_i32, %c0_i32_0 : i32, i32
  }
  func.func @transform_10(%arg0: i32) -> (i32, i32) {
    %c0_i32 = arith.constant 0 : i32
    %c0_i32_0 = arith.constant 0 : i32
    %c0_i32_1 = arith.constant 0 : i32
    return %c0_i32, %c0_i32_0 : i32, i32
  }
  func.func @transform_11(%arg0: i32) -> (i32, i32) {
    %c0_i32 = arith.constant 0 : i32
    %c0_i32_0 = arith.constant 0 : i32
    %c0_i32_1 = arith.constant 0 : i32
    return %c0_i32, %c0_i32_0 : i32, i32
  }
  func.func @transform_12(%arg0: i32) -> (i32, i32) {
    %c0_i32 = arith.constant 0 : i32
    %c0_i32_0 = arith.constant 0 : i32
    %c0_i32_1 = arith.constant 0 : i32
    return %c0_i32, %c0_i32_0 : i32, i32
  }
  func.func @transform_13(%arg0: i32) -> (i32, i32) {
    %c0_i32 = arith.constant 0 : i32
    %c0_i32_0 = arith.constant 0 : i32
    %c0_i32_1 = arith.constant 0 : i32
    return %c0_i32, %c0_i32_0 : i32, i32
  }
  func.func @transform_14(%arg0: i32) -> (i32, i32) {
    %c0_i32 = arith.constant 0 : i32
    %c0_i32_0 = arith.constant 0 : i32
    %c0_i32_1 = arith.constant 0 : i32
    return %c0_i32, %c0_i32_0 : i32, i32
  }
  func.func @transform_15(%arg0: i32) -> (i32, i32) {
    %c0_i32 = arith.constant 0 : i32
    %c0_i32_0 = arith.constant 0 : i32
    %c0_i32_1 = arith.constant 0 : i32
    return %c0_i32, %c0_i32_0 : i32, i32
  }
  func.func @transform_16(%arg0: i32) -> (i32, i32) {
    %c0_i32 = arith.constant 0 : i32
    %c0_i32_0 = arith.constant 0 : i32
    %c0_i32_1 = arith.constant 0 : i32
    return %c0_i32, %c0_i32_0 : i32, i32
  }
  func.func @transform_17(%arg0: i32) -> (i32, i32) {
    %c0_i32 = arith.constant 0 : i32
    %c0_i32_0 = arith.constant 0 : i32
    %c0_i32_1 = arith.constant 0 : i32
    return %c0_i32, %c0_i32_0 : i32, i32
  }
  func.func @transform_18(%arg0: i32) -> (i32, i32) {
    %c0_i32 = arith.constant 0 : i32
    %c0_i32_0 = arith.constant 0 : i32
    %c0_i32_1 = arith.constant 0 : i32
    return %c0_i32, %c0_i32_0 : i32, i32
  }
  func.func @transform_19(%arg0: i32) -> (i32, i32) {
    %c0_i32 = arith.constant 0 : i32
    %c0_i32_0 = arith.constant 0 : i32
    %c0_i32_1 = arith.constant 0 : i32
    return %c0_i32, %c0_i32_0 : i32, i32
  }
  func.func @transform_20(%arg0: i32) -> (i32, i32) {
    %c0_i32 = arith.constant 0 : i32
    %c0_i32_0 = arith.constant 0 : i32
    %c0_i32_1 = arith.constant 0 : i32
    return %c0_i32, %c0_i32_0 : i32, i32
  }
  func.func @transform_21(%arg0: i32) -> (i32, i32) {
    %c0_i32 = arith.constant 0 : i32
    %c0_i32_0 = arith.constant 0 : i32
    return %arg0, %c0_i32 : i32, i32
  }
}

</mosaic_0001>

<bundles_post_ra>
// kernel: regression_nn_forward.1
= control target key start
LH: loop header
LB: loop body
LE: loop exit
PB: predicated region body
PF: predicated region fallthrough
CT: control target
= control target key end

     0   :  { %v1944_v1 = vmov 0   ;;  %v89_v63 = vlaneseq  ;;  %vm1946_vm0 = vmmov 0   ;;  %s2523_s1 = inlined_call_operand.vmem [shape: bf16[128,256], index: 1, kind: input, shape index: {}]   ;;  %s2524_s3 = inlined_call_operand.vmem [shape: bf16[256,256], index: 3, kind: input, shape index: {}]   ;;  %s2525_s0 = inlined_call_operand.vmem [shape: f32[8,128], index: 0, kind: input, shape index: {}]   ;;  %s2526_s5 = inlined_call_operand.vmem [shape: bf16[256,128], index: 5, kind: input, shape index: {}]   ;;  %s2527_s2 = inlined_call_operand.vmem [shape: f32[1,256], index: 2, kind: input, shape index: {}]   ;;  %s2528_s7 = inlined_call_operand.vmem [shape: bf16[128,128], index: 7, kind: input, shape index: {}]   ;;  %s2529_s4 = inlined_call_operand.vmem [shape: f32[1,256], index: 4, kind: input, shape index: {}]   ;;  %s2530_s9 = inlined_call_operand.vmem [shape: bf16[128,128], index: 9, kind: input, shape index: {}]   ;;  %s2531_s6 = inlined_call_operand.vmem [shape: f32[1,128], index: 6, kind: input, shape index: {}]   ;;  %s2532_s11 = inlined_call_operand.vmem [shape: bf16[128,128], index: 11, kind: input, shape index: {}]   ;;  %s2533_s8 = inlined_call_operand.vmem [shape: f32[1,128], index: 8, kind: input, shape index: {}]   ;;  %s2534_s13 = inlined_call_operand.vmem [shape: bf16[128,128], index: 13, kind: input, shape index: {}]   ;;  %s2535_s10 = inlined_call_operand.vmem [shape: f32[1,128], index: 10, kind: input, shape index: {}]   ;;  %s2536_s15 = inlined_call_operand.vmem [shape: bf16[128,128], index: 15, kind: input, shape index: {}]   ;;  %s2537_s12 = inlined_call_operand.vmem [shape: f32[1,128], index: 12, kind: input, shape index: {}]   ;;  %s2538_s17 = inlined_call_operand.vmem [shape: bf16[128,128], index: 17, kind: input, shape index: {}]   ;;  %s2539_s14 = inlined_call_operand.vmem [shape: f32[1,128], index: 14, kind: input, shape index: {}]   ;;  %s2540_s19 = inlined_call_operand.vmem [shape: bf16[128,128], index: 19, kind: input, shape index: {}]   ;;  %s2541_s16 = inlined_call_operand.vmem [shape: f32[1,128], index: 16, kind: input, shape index: {}]   ;;  %s2542_s18 = inlined_call_operand.vmem [shape: f32[1,128], index: 18, kind: input, shape index: {}]   ;;  %s2543_s20 = inlined_call_operand.vmem [shape: f32[1,128], index: 20, kind: input, shape index: {}]   ;;  %s2544_s21 = inlined_call_operand.vmem [shape: f32[8,128], index: 21, kind: output, shape index: {}]  }
   0x1   :  { %2549 = sst [smem:[#allocation2_spill]] %s2523_s1  ;;  %211 = vmatprep.mubr.bf16.mxu0 %v1944_v1 }
   0x2   :  { %2550 = sst [smem:[#allocation3_spill]] %s2524_s3  ;;  %s2555_s26 = sld [smem:[#allocation2_spill]] }
   0x3   :  { %2551 = sst [smem:[#allocation4_spill]] %s2525_s0  ;;  %s2556_s1 = sld [smem:[#allocation3_spill]] }
   0x4   :  { %2552 = sst [smem:[#allocation5_spill]] %s2526_s5  ;;  %s2557_s24 = sld [smem:[#allocation4_spill]] }
   0x5   :  { %2553 = sst [smem:[#allocation6_spill]] %s2527_s2 }
   0x6   :  { %2554 = sst [smem:[#allocation7_spill]] %s2528_s7  ;;  %s2559_s27 = sld [smem:[#allocation6_spill]] }
   0x7   :  { %s2560_s0 = sld [smem:[#allocation7_spill]] }
   0x8   :  { %v1800_v0 = vld [vmem:[%s2555_s26 + $0x4] ss:$8 sps:$4 sm:$0xff]   ;;  %v1802_v2 = vld [vmem:[%s2555_s26] ss:$8 sps:$4 sm:$0xff]   ;;  %v1803_v3 = vld [vmem:[%s2555_s26 + $0x14] ss:$8 sps:$4 sm:$0xff]  }
   0x9   :  { %179 = vmatprep.subr.bf16.mxu0 %v1800_v0  ;;  %v1805_v4 = vld [vmem:[%s2555_s26 + $0x10] ss:$8 sps:$4 sm:$0xff]   ;;  %v1806_v5 = vld [vmem:[%s2555_s26 + $0x24] ss:$8 sps:$4 sm:$0xff]   ;;  %v1808_v6 = vld [vmem:[%s2555_s26 + $0x20] ss:$8 sps:$4 sm:$0xff]  }
   0xa   :  { %180 = vmatpush1.bf16.msra.mxu0 %v1802_v2  ;;  %v1809_v7 = vld [vmem:[%s2555_s26 + $0x34] ss:$8 sps:$4 sm:$0xff]   ;;  %v1811_v8 = vld [vmem:[%s2555_s26 + $0x30] ss:$8 sps:$4 sm:$0xff]   ;;  %v1812_v9 = vld [vmem:[%s2555_s26 + $0x44] ss:$8 sps:$4 sm:$0xff]  }
   0xb   :  { %181 = vmatprep.subr.bf16.mxu0 %v1803_v3  ;;  %v1824_v10 = vld [vmem:[%s2556_s1 + $0x4] ss:$8 sps:$4 sm:$0xff]   ;;  %v1826_v11 = vld [vmem:[%s2556_s1] ss:$8 sps:$4 sm:$0xff]   ;;  %v1827_v12 = vld [vmem:[%s2556_s1 + $0x14] ss:$8 sps:$4 sm:$0xff]  }
   0xc   :  { %428 = vmatprep.subr.bf16.mxu1 %v1824_v10  ;;  %v1814_v13 = vld [vmem:[%s2555_s26 + $0x40] ss:$8 sps:$4 sm:$0xff]   ;;  %v1829_v14 = vld [vmem:[%s2556_s1 + $0x10] ss:$8 sps:$4 sm:$0xff]   ;;  %v1830_v15 = vld [vmem:[%s2556_s1 + $0x24] ss:$8 sps:$4 sm:$0xff]  }
   0xd   :  { %429 = vmatpush1.bf16.msra.mxu1 %v1826_v11  ;;  %v1815_v16 = vld [vmem:[%s2555_s26 + $0x54] ss:$8 sps:$4 sm:$0xff]   ;;  %v1817_v17 = vld [vmem:[%s2555_s26 + $0x50] ss:$8 sps:$4 sm:$0xff]   ;;  %v1832_v18 = vld [vmem:[%s2556_s1 + $0x20] ss:$8 sps:$4 sm:$0xff]  }
   0xe   :  { %182 = vmatpush1.bf16.msra.mxu0 %v1805_v4  ;;  %430 = vmatprep.subr.bf16.mxu1 %v1827_v12  ;;  %v1833_v19 = vld [vmem:[%s2556_s1 + $0x34] ss:$8 sps:$4 sm:$0xff]   ;;  %v1818_v20 = vld [vmem:[%s2555_s26 + $0x64] ss:$8 sps:$4 sm:$0xff]   ;;  %v1820_v21 = vld [vmem:[%s2555_s26 + $0x60] ss:$8 sps:$4 sm:$0xff]  }
   0xf   :  { %183 = vmatprep.subr.bf16.mxu0 %v1806_v5  ;;  %v1835_v22 = vld [vmem:[%s2556_s1 + $0x30] ss:$8 sps:$4 sm:$0xff]   ;;  %v1836_v23 = vld [vmem:[%s2556_s1 + $0x44] ss:$8 sps:$4 sm:$0xff]   ;;  %v1821_v24 = vld [vmem:[%s2555_s26 + $0x74] ss:$8 sps:$4 sm:$0xff]  }
  0x10   :  { %v1823_v25 = vld [vmem:[%s2555_s26 + $0x70] ss:$8 sps:$4 sm:$0xff]   ;;  %v69_v26 = vld [vmem:[%s2557_s24] sm:$0xff]  ;;  %v1839_v28 = vld [vmem:[%s2556_s1 + $0x54] ss:$8 sps:$4 sm:$0xff]   ;;  %s2558_s26 = sld [smem:[#allocation5_spill]] }
  0x11   :  { %431 = vmatpush1.bf16.msra.mxu1 %v1829_v14  ;;  %v1838_v27 = vld [vmem:[%s2556_s1 + $0x40] ss:$8 sps:$4 sm:$0xff]   ;;  %v1841_v29 = vld [vmem:[%s2556_s1 + $0x50] ss:$8 sps:$4 sm:$0xff]   ;;  %v87_v30 = vpack.c.bf16 %v69_v26, %v69_v26  ;;  %v1842_v31 = vld [vmem:[%s2556_s1 + $0x64] ss:$8 sps:$4 sm:$0xff]  }
  0x12   :  { %184 = vmatpush1.bf16.msra.mxu0 %v1808_v6  ;;  %432 = vmatprep.subr.bf16.mxu1 %v1830_v15  ;;  %v1844_v32 = vld [vmem:[%s2556_s1 + $0x60] ss:$8 sps:$4 sm:$0xff]   ;;  %v1845_v33 = vld [vmem:[%s2556_s1 + $0x74] ss:$8 sps:$4 sm:$0xff]   ;;  %v1847_v34 = vld [vmem:[%s2556_s1 + $0x70] ss:$8 sps:$4 sm:$0xff]  }
  0x13   :  { %185 = vmatprep.subr.bf16.mxu0 %v1809_v7  ;;  %v1848_v35 = vld [vmem:[%s2556_s1 + $0x84] ss:$8 sps:$4 sm:$0xff]   ;;  %v1850_v36 = vld [vmem:[%s2556_s1 + $0x80] ss:$8 sps:$4 sm:$0xff]   ;;  %v1851_v37 = vld [vmem:[%s2556_s1 + $0x94] ss:$8 sps:$4 sm:$0xff]  }
  0x14   :  { %v1853_v38 = vld [vmem:[%s2556_s1 + $0x90] ss:$8 sps:$4 sm:$0xff]   ;;  %v1854_v39 = vld [vmem:[%s2556_s1 + $0xa4] ss:$8 sps:$4 sm:$0xff]   ;;  %v1856_v40 = vld [vmem:[%s2556_s1 + $0xa0] ss:$8 sps:$4 sm:$0xff]  }
  0x15   :  { %433 = vmatpush1.bf16.msra.mxu1 %v1832_v18  ;;  %v1857_v41 = vld [vmem:[%s2556_s1 + $0xb4] ss:$8 sps:$4 sm:$0xff]   ;;  %v1859_v42 = vld [vmem:[%s2556_s1 + $0xb0] ss:$8 sps:$4 sm:$0xff]   ;;  %v1860_v43 = vld [vmem:[%s2556_s1 + $0xc4] ss:$8 sps:$4 sm:$0xff]  }
  0x16   :  { %186 = vmatpush1.bf16.msra.mxu0 %v1811_v8  ;;  %434 = vmatprep.subr.bf16.mxu1 %v1833_v19  ;;  %v1862_v44 = vld [vmem:[%s2556_s1 + $0xc0] ss:$8 sps:$4 sm:$0xff]   ;;  %v1863_v45 = vld [vmem:[%s2556_s1 + $0xd4] ss:$8 sps:$4 sm:$0xff]   ;;  %v1865_v46 = vld [vmem:[%s2556_s1 + $0xd0] ss:$8 sps:$4 sm:$0xff]  }
  0x17   :  { %187 = vmatprep.subr.bf16.mxu0 %v1812_v9  ;;  %v1866_v47 = vld [vmem:[%s2556_s1 + $0xe4] ss:$8 sps:$4 sm:$0xff]   ;;  %v1868_v48 = vld [vmem:[%s2556_s1 + $0xe0] ss:$8 sps:$4 sm:$0xff]   ;;  %v1869_v49 = vld [vmem:[%s2556_s1 + $0xf4] ss:$8 sps:$4 sm:$0xff]  }
  0x18   :  { %v1871_v50 = vld [vmem:[%s2556_s1 + $0xf0] ss:$8 sps:$4 sm:$0xff]   ;;  %v1872_v51 = vld [vmem:[%s2558_s26 + $0x40] sm:$0xff]   ;;  %v1874_v53 = vld [vmem:[%s2558_s26 + $0x48] sm:$0xff]   ;;  %v90_v0 = vshrl.u32 %v89_v63, 7 }
  0x19   :  { %435 = vmatpush1.bf16.msra.mxu1 %v1835_v22  ;;  %v1873_v52 = vld [vmem:[%s2558_s26] sm:$0xff]   ;;  %v1875_v54 = vld [vmem:[%s2558_s26 + $0x8] sm:$0xff]   ;;  %v1876_v55 = vld [vmem:[%s2558_s26 + $0x50] sm:$0xff]  }
  0x1a   :  { %188 = vmatpush1.bf16.msra.mxu0 %v1814_v13  ;;  %436 = vmatprep.subr.bf16.mxu1 %v1836_v23  ;;  %v1877_v56 = vld [vmem:[%s2558_s26 + $0x10] sm:$0xff]   ;;  %v1878_v57 = vld [vmem:[%s2558_s26 + $0x58] sm:$0xff]   ;;  %v1880_v59 = vld [vmem:[%s2558_s26 + $0x60] sm:$0xff]   ;;  %v91_v1 = vsub.s32 0, %v90_v0  ;;  %v95_v3 = vsub.s32 1, %v90_v0 }
  0x1b   :  { %189 = vmatprep.subr.bf16.mxu0 %v1815_v16  ;;  %v1879_v58 = vld [vmem:[%s2558_s26 + $0x18] sm:$0xff]   ;;  %v1881_v60 = vld [vmem:[%s2558_s26 + $0x20] sm:$0xff]   ;;  %v1882_v61 = vld [vmem:[%s2558_s26 + $0x68] sm:$0xff]  }
  0x1c   :  { %v1883_v62 = vld [vmem:[%s2558_s26 + $0x28] sm:$0xff]   ;;  %v86_v2 = vld [vmem:[%s2559_s27] sm:$0x3]  ;;  %v1884_v16 = vld [vmem:[%s2558_s26 + $0x70] sm:$0xff]  }
  0x1d   :  { %437 = vmatpush1.bf16.msra.mxu1 %v1838_v27  ;;  %v92_v4 = vrot.slane %v86_v2, %v91_v1  ;;  %v96_v5 = vrot.slane %v86_v2, %v95_v3  ;;  %v1886_v18 = vld [vmem:[%s2558_s26 + $0x78] sm:$0xff]   ;;  %v1908_v63 = vld [vmem:[%s2532_s11 + $0x20] sm:$0xff]   ;;  %v1909_v0 = vld [vmem:[%s2532_s11 + $0x28] sm:$0xff]  }
  0x1e   :  { %190 = vmatpush1.bf16.msra.mxu0 %v1817_v17  ;;  %438 = vmatprep.subr.bf16.mxu1 %v1839_v28  ;;  %v1885_v17 = vld [vmem:[%s2558_s26 + $0x30] sm:$0xff]   ;;  %v1887_v19 = vld [vmem:[%s2558_s26 + $0x38] sm:$0xff]  }
  0x1f   :  { %191 = vmatprep.subr.bf16.mxu0 %v1818_v20  ;;  %v1945_v20 = vmov 0.0  }
  0x21   :  { %439 = vmatpush1.bf16.msra.mxu1 %v1841_v29 }
  0x22   :  { %192 = vmatpush1.bf16.msra.mxu0 %v1820_v21  ;;  %440 = vmatprep.subr.bf16.mxu1 %v1842_v31  ;;  %v254_v21 = vld [vmem:[%s2529_s4] sm:$0x3] }
  0x23   :  { %193 = vmatprep.subr.bf16.mxu0 %v1821_v24  ;;  %v261_v22 = vrot.slane %v254_v21, %v91_v1  ;;  %v265_v23 = vrot.slane %v254_v21, %v95_v3  ;;  %v1509_v1 = vld [vmem:[%s2533_s8] ss:$0 sm:$0xff] }
  0x25   :  { %441 = vmatpush1.bf16.msra.mxu1 %v1844_v32 }
  0x26   :  { %194 = vmatpush1.bf16.msra.mxu0 %v1823_v25  ;;  %442 = vmatprep.subr.bf16.mxu1 %v1845_v33  ;;  %v1888_v33 = vld [vmem:[%s2560_s0] sm:$0xff]  }
  0x27   :  { %1572 = vmatprep.subr.bf16.mxu0 %v1872_v51 }
  0x29   :  { %212 = vmatmul.mubr.bf16.vlgmr.msra.gmra.mrb[0].mxu0 %v87_v30  ;;  %443 = vmatpush1.bf16.msra.mxu1 %v1847_v34 }
  0x2a   :  { %444 = vmatprep.subr.bf16.mxu1 %v1848_v35  ;;  %1573 = vmatpush3.bf16.msra.mxu0 %v1873_v52  ;;  %v1889_v35 = vld [vmem:[%s2560_s0 + $0x8] sm:$0xff]  }
  0x2b   :  { %1574 = vmatprep.subr.bf16.mxu0 %v1874_v53 }
  0x2d   :  { %445 = vmatpush1.bf16.msra.mxu1 %v1850_v36  ;;  %v1890_v36 = vld [vmem:[%s2560_s0 + $0x10] sm:$0xff]  }
  0x2e   :  { %446 = vmatprep.subr.bf16.mxu1 %v1851_v37  ;;  %1575 = vmatpush3.bf16.msra.mxu0 %v1875_v54  ;;  %v1891_v37 = vld [vmem:[%s2560_s0 + $0x18] sm:$0xff]  }
  0x2f   :  { %1576 = vmatprep.subr.bf16.mxu0 %v1876_v55 }
  0x31   :  { %447 = vmatpush1.bf16.msra.mxu1 %v1853_v38  ;;  %v1892_v38 = vld [vmem:[%s2560_s0 + $0x20] sm:$0xff]  }
  0x32   :  { %448 = vmatprep.subr.bf16.mxu1 %v1854_v39  ;;  %1577 = vmatpush3.bf16.msra.mxu0 %v1877_v56  ;;  %v1893_v39 = vld [vmem:[%s2560_s0 + $0x28] sm:$0xff]  }
  0x33   :  { %1578 = vmatprep.subr.bf16.mxu0 %v1878_v57  ;;  %v1902_v57 = vld [vmem:[%s2530_s9 + $0x30] sm:$0xff]  }
  0x35   :  { %449 = vmatpush1.bf16.msra.mxu1 %v1856_v40  ;;  %v1894_v40 = vld [vmem:[%s2560_s0 + $0x30] sm:$0xff]  }
  0x36   :  { %450 = vmatprep.subr.bf16.mxu1 %v1857_v41  ;;  %1579 = vmatpush3.bf16.msra.mxu0 %v1879_v58  ;;  %v1895_v41 = vld [vmem:[%s2560_s0 + $0x38] sm:$0xff]  }
  0x37   :  { %1580 = vmatprep.subr.bf16.mxu0 %v1880_v59  ;;  %v1903_v58 = vld [vmem:[%s2530_s9 + $0x38] sm:$0xff]   ;;  %v1904_v59 = vld [vmem:[%s2532_s11] sm:$0xff]  }
  0x39   :  { %451 = vmatpush1.bf16.msra.mxu1 %v1859_v42  ;;  %v1896_v42 = vld [vmem:[%s2530_s9] sm:$0xff]  }
  0x3a   :  { %452 = vmatprep.subr.bf16.mxu1 %v1860_v43  ;;  %1581 = vmatpush3.bf16.msra.mxu0 %v1881_v60  ;;  %v1897_v43 = vld [vmem:[%s2530_s9 + $0x8] sm:$0xff]  }
  0x3b   :  { %1582 = vmatprep.subr.bf16.mxu0 %v1882_v61  ;;  %v1905_v60 = vld [vmem:[%s2532_s11 + $0x8] sm:$0xff]   ;;  %v1906_v61 = vld [vmem:[%s2532_s11 + $0x10] sm:$0xff]  }
  0x3d   :  { %453 = vmatpush1.bf16.msra.mxu1 %v1862_v44  ;;  %v1898_v44 = vld [vmem:[%s2530_s9 + $0x10] sm:$0xff]  }
  0x3e   :  { %454 = vmatprep.subr.bf16.mxu1 %v1863_v45  ;;  %1583 = vmatpush3.bf16.msra.mxu0 %v1883_v62  ;;  %v1899_v45 = vld [vmem:[%s2530_s9 + $0x18] sm:$0xff]  }
  0x3f   :  { %1584 = vmatprep.subr.bf16.mxu0 %v1884_v16  ;;  %v1907_v62 = vld [vmem:[%s2532_s11 + $0x18] sm:$0xff]   ;;  %v1917_v16 = vld [vmem:[%s2534_s13 + $0x28] sm:$0xff]  }
  0x41   :  { %455 = vmatpush1.bf16.msra.mxu1 %v1865_v46  ;;  %v1900_v46 = vld [vmem:[%s2530_s9 + $0x20] sm:$0xff]  }
  0x42   :  { %456 = vmatprep.subr.bf16.mxu1 %v1866_v47  ;;  %1585 = vmatpush3.bf16.msra.mxu0 %v1885_v17  ;;  %v1901_v47 = vld [vmem:[%s2530_s9 + $0x28] sm:$0xff]   ;;  %v1518_v17 = vld [vmem:[%s2535_s10] ss:$0 sm:$0xff] }
  0x43   :  { %1586 = vmatprep.subr.bf16.mxu0 %v1886_v18 }
  0x45   :  { %457 = vmatpush1.bf16.msra.mxu1 %v1868_v48 }
  0x46   :  { %458 = vmatprep.subr.bf16.mxu1 %v1869_v49  ;;  %1587 = vmatpush3.bf16.msra.mxu0 %v1887_v19  ;;  %v1492_v49 = vld [vmem:[%s2531_s6] ss:$0 sm:$0xff] }
  0x47   :  { %1657 = vmatprep.subr.bf16.mxu0 %v1945_v20 }
  0x49   :  { %459 = vmatpush1.bf16.msra.mxu1 %v1871_v50 }
  0x4a   :  { %1677 = vmatprep.subr.bf16.mxu1 %v1945_v20 }
  0xfc   :  { %v213_v6 = vpop.f32.mrb[0].mxu0 }
  0xfd   :  { %v214_v7 = vadd.f32 %v213_v6, %v92_v4  ;;  %v215_v8 = vpop.f32.mrb[1].mxu0 }
  0xfe   :  { %v216_v9 = vadd.f32 %v215_v8, %v96_v5  ;;  %v217_v10 = vpop.f32.mrb[2].mxu0 }
  0xff   :  { %v220_v11 = vmax.f32 %v214_v7, 0.0  ;;  %v218_v12 = vpop.f32.mrb[3].mxu0  ;;  %v1911_v10 = vld [vmem:[%s2532_s11 + $0x38] sm:$0xff]  }
 0x100   :  { %v221_v13 = vmax.f32 %v216_v9, 0.0  ;;  %v1910_v9 = vld [vmem:[%s2532_s11 + $0x30] sm:$0xff]   ;;  %v1913_v12 = vld [vmem:[%s2534_s13 + $0x8] sm:$0xff]  }
 0x101   :  { %v255_v15 = vpack.c.bf16 %v220_v11, %v220_v11  ;;  %v1912_v11 = vld [vmem:[%s2534_s13] sm:$0xff]  }
 0x102   :  { %v256_v14 = vpack.c.bf16 %v221_v13, %v221_v13  ;;  %v1914_v13 = vld [vmem:[%s2534_s13 + $0x10] sm:$0xff]  }
 0x104   :  { %460 = vmatprep.mubr.bf16.mxu1 %v256_v14  ;;  %v1915_v14 = vld [vmem:[%s2534_s13 + $0x18] sm:$0xff]  }
 0x105   :  { %461 = vmatmul.mubr.bf16.vlgmr.msra.gmra.mrb[0].mxu1 %v255_v15  ;;  %v1916_v15 = vld [vmem:[%s2534_s13 + $0x20] sm:$0xff]  }
 0x106   :  { %1693 = vmatprep.mubr.msk.bf16.mxu1 %vm1946_vm0, %v1945_v20  ;;  %1678 = vmatpush3.bf16.msra.mxu1 %v1896_v42  ;;  %v1926_v42 = vld [vmem:[%s2536_s15 + $0x30] sm:$0xff]  }
 0x107   :  { %1679 = vmatprep.subr.bf16.mxu1 %v1945_v20 }
 0x10a   :  { %1680 = vmatpush3.bf16.msra.mxu1 %v1897_v43  ;;  %v1927_v43 = vld [vmem:[%s2536_s15 + $0x38] sm:$0xff]  }
 0x10b   :  { %1681 = vmatprep.subr.bf16.mxu1 %v1945_v20 }
 0x10e   :  { %1682 = vmatpush3.bf16.msra.mxu1 %v1898_v44  ;;  %v1928_v44 = vld [vmem:[%s2538_s17] sm:$0xff]  }
 0x10f   :  { %1683 = vmatprep.subr.bf16.mxu1 %v1945_v20 }
 0x112   :  { %1684 = vmatpush3.bf16.msra.mxu1 %v1899_v45  ;;  %v1929_v45 = vld [vmem:[%s2538_s17 + $0x8] sm:$0xff]  }
 0x113   :  { %1685 = vmatprep.subr.bf16.mxu1 %v1945_v20 }
 0x116   :  { %1686 = vmatpush3.bf16.msra.mxu1 %v1900_v46  ;;  %v1930_v46 = vld [vmem:[%s2538_s17 + $0x10] sm:$0xff]  }
 0x117   :  { %1687 = vmatprep.subr.bf16.mxu1 %v1945_v20 }
 0x11a   :  { %1688 = vmatpush3.bf16.msra.mxu1 %v1901_v47  ;;  %v1931_v47 = vld [vmem:[%s2538_s17 + $0x18] sm:$0xff]  }
 0x11b   :  { %1689 = vmatprep.subr.bf16.mxu1 %v1945_v20 }
 0x11e   :  { %1690 = vmatpush3.bf16.msra.mxu1 %v1902_v57 }
 0x11f   :  { %1691 = vmatprep.subr.bf16.mxu1 %v1945_v20 }
 0x122   :  { %1692 = vmatpush3.bf16.msra.mxu1 %v1903_v58  ;;  %v1934_v58 = vld [vmem:[%s2538_s17 + $0x30] sm:$0xff]  }
 0x123   :  { %1717 = vmatprep.subr.bf16.mxu1 %v1945_v20 }
 0x1d8   :  { %v462_v24 = vpop.f32.mrb[0].mxu1 }
 0x1d9   :  { %v463_v25 = vadd.f32 %v462_v24, %v261_v22  ;;  %v464_v26 = vpop.f32.mrb[1].mxu1 }
 0x1da   :  { %v465_v27 = vadd.f32 %v464_v26, %v265_v23  ;;  %v466_v28 = vpop.f32.mrb[2].mxu1  ;;  %v1918_v26 = vld [vmem:[%s2534_s13 + $0x30] sm:$0xff]  }
 0x1db   :  { %v469_v29 = vmax.f32 %v463_v25, 0.0  ;;  %v467_v30 = vpop.f32.mrb[3].mxu1  ;;  %v1920_v28 = vld [vmem:[%s2536_s15] sm:$0xff]  }
 0x1dc   :  { %v470_v31 = vmax.f32 %v465_v27, 0.0  ;;  %v1919_v27 = vld [vmem:[%s2534_s13 + $0x38] sm:$0xff]   ;;  %v1922_v30 = vld [vmem:[%s2536_s15 + $0x10] sm:$0xff]  }
 0x1dd   :  { %v504_v34 = vpack.c.bf16 %v469_v29, %v469_v29  ;;  %v1921_v29 = vld [vmem:[%s2536_s15 + $0x8] sm:$0xff]  }
 0x1de   :  { %v505_v32 = vpack.c.bf16 %v470_v31, %v470_v31  ;;  %v1923_v31 = vld [vmem:[%s2536_s15 + $0x18] sm:$0xff]  }
 0x1e0   :  { %640 = vmatprep.mubr.bf16.mxu0 %v505_v32  ;;  %v1924_v32 = vld [vmem:[%s2536_s15 + $0x20] sm:$0xff]  }
 0x1e1   :  { %641 = vmatmul.mubr.bf16.vlgmr.msra.gmra.mrb[4].mxu0 %v504_v34  ;;  %v1527_v34 = vld [vmem:[%s2537_s12] ss:$0 sm:$0xff] }
 0x1e2   :  { %1658 = vmatpush3.bf16.msra.mxu0 %v1888_v33  ;;  %1673 = vmatprep.mubr.msk.bf16.mxu0 %vm1946_vm0, %v1945_v20  ;;  %v1925_v33 = vld [vmem:[%s2536_s15 + $0x28] sm:$0xff]  }
 0x1e3   :  { %1659 = vmatprep.subr.bf16.mxu0 %v1945_v20 }
 0x1e6   :  { %1660 = vmatpush3.bf16.msra.mxu0 %v1889_v35 }
 0x1e7   :  { %1661 = vmatprep.subr.bf16.mxu0 %v1945_v20 }
 0x1ea   :  { %1662 = vmatpush3.bf16.msra.mxu0 %v1890_v36 }
 0x1eb   :  { %1663 = vmatprep.subr.bf16.mxu0 %v1945_v20 }
 0x1ee   :  { %1664 = vmatpush3.bf16.msra.mxu0 %v1891_v37 }
 0x1ef   :  { %1665 = vmatprep.subr.bf16.mxu0 %v1945_v20 }
 0x1f2   :  { %1666 = vmatpush3.bf16.msra.mxu0 %v1892_v38 }
 0x1f3   :  { %1667 = vmatprep.subr.bf16.mxu0 %v1945_v20 }
 0x1f6   :  { %1668 = vmatpush3.bf16.msra.mxu0 %v1893_v39 }
 0x1f7   :  { %1669 = vmatprep.subr.bf16.mxu0 %v1945_v20 }
 0x1fa   :  { %1670 = vmatpush3.bf16.msra.mxu0 %v1894_v40 }
 0x1fb   :  { %1671 = vmatprep.subr.bf16.mxu0 %v1945_v20 }
 0x1fe   :  { %1672 = vmatpush3.bf16.msra.mxu0 %v1895_v41 }
 0x1ff   :  { %1697 = vmatprep.subr.bf16.mxu0 %v1945_v20 }
 0x2b4   :  { %v1588_v48 = vpop.f32.mrb[4].mxu0 }
 0x2b5   :  { %v1589_v50 = vpop.f32.mrb[5].mxu0 }
 0x2b6   :  { %v1590_v51 = vadd.f32 %v1589_v50, %v1588_v48  ;;  %v1591_v52 = vpop.f32.mrb[6].mxu0  ;;  %v1932_v48 = vld [vmem:[%s2538_s17 + $0x20] sm:$0xff]  }
 0x2b7   :  { %v1592_v53 = vpop.f32.mrb[7].mxu0  ;;  %v1536_v50 = vld [vmem:[%s2539_s14] ss:$0 sm:$0xff] }
 0x2b8   :  { %v643_v54 = vadd.f32 %v1590_v51, %v1492_v49  ;;  %v1933_v49 = vld [vmem:[%s2538_s17 + $0x28] sm:$0xff]  }
 0x2ba   :  { %v648_v55 = vmax.f32 %v643_v54, 0.0 }
 0x2bc   :  { %v666_v56 = vpack.c.bf16 %v648_v55, %v648_v55 }
 0x2be   :  { %1674 = vmatmul.mubr.bf16.vlgmr.msra.gmra.mrb[8].mxu0 %v666_v56 }
 0x2bf   :  { %1713 = vmatprep.mubr.msk.bf16.mxu0 %vm1946_vm0, %v1945_v20  ;;  %1698 = vmatpush3.bf16.msra.mxu0 %v1904_v59  ;;  %v1935_v59 = vld [vmem:[%s2538_s17 + $0x38] sm:$0xff]  }
 0x2c0   :  { %1699 = vmatprep.subr.bf16.mxu0 %v1945_v20 }
 0x2c3   :  { %1700 = vmatpush3.bf16.msra.mxu0 %v1905_v60  ;;  %v1936_v60 = vld [vmem:[%s2540_s19] sm:$0xff]  }
 0x2c4   :  { %1701 = vmatprep.subr.bf16.mxu0 %v1945_v20 }
 0x2c7   :  { %1702 = vmatpush3.bf16.msra.mxu0 %v1906_v61  ;;  %v1937_v61 = vld [vmem:[%s2540_s19 + $0x8] sm:$0xff]  }
 0x2c8   :  { %1703 = vmatprep.subr.bf16.mxu0 %v1945_v20 }
 0x2cb   :  { %1704 = vmatpush3.bf16.msra.mxu0 %v1907_v62  ;;  %v1938_v62 = vld [vmem:[%s2540_s19 + $0x10] sm:$0xff]  }
 0x2cc   :  { %1705 = vmatprep.subr.bf16.mxu0 %v1945_v20 }
 0x2cf   :  { %1706 = vmatpush3.bf16.msra.mxu0 %v1908_v63  ;;  %v1939_v63 = vld [vmem:[%s2540_s19 + $0x18] sm:$0xff]  }
 0x2d0   :  { %1707 = vmatprep.subr.bf16.mxu0 %v1945_v20 }
 0x2d3   :  { %1708 = vmatpush3.bf16.msra.mxu0 %v1909_v0  ;;  %v1940_v0 = vld [vmem:[%s2540_s19 + $0x20] sm:$0xff]  }
 0x2d4   :  { %1709 = vmatprep.subr.bf16.mxu0 %v1945_v20 }
 0x2d7   :  { %1710 = vmatpush3.bf16.msra.mxu0 %v1910_v9 }
 0x2d8   :  { %1711 = vmatprep.subr.bf16.mxu0 %v1945_v20 }
 0x2db   :  { %1712 = vmatpush3.bf16.msra.mxu0 %v1911_v10  ;;  %v1942_v10 = vld [vmem:[%s2540_s19 + $0x30] sm:$0xff]  }
 0x2dc   :  { %1737 = vmatprep.subr.bf16.mxu0 %v1945_v20 }
 0x391   :  { %v755_v2 = vpop.f32.mrb[8].mxu0 }
 0x392   :  { %v756_v3 = vadd.f32 %v1509_v1, %v755_v2  ;;  %v1675_v4 = vpop.f32.mrb[9].mxu0  ;;  %v1941_v1 = vld [vmem:[%s2540_s19 + $0x28] sm:$0xff]   ;;  %v1545_v2 = vld [vmem:[%s2541_s16] ss:$0 sm:$0xff] }
 0x393   :  { %v758_v5 = vpop.f32.mrb[10].mxu0 }
 0x394   :  { %v761_v6 = vmax.f32 %v756_v3, 0.0  ;;  %v1676_v7 = vpop.f32.mrb[11].mxu0 }
 0x396   :  { %v779_v8 = vpack.c.bf16 %v761_v6, %v761_v6 }
 0x398   :  { %1694 = vmatmul.mubr.bf16.vlgmr.msra.gmra.mrb[4].mxu1 %v779_v8 }
 0x399   :  { %1733 = vmatprep.mubr.msk.bf16.mxu1 %vm1946_vm0, %v1945_v20  ;;  %1718 = vmatpush3.bf16.msra.mxu1 %v1912_v11  ;;  %v1943_v11 = vld [vmem:[%s2540_s19 + $0x38] sm:$0xff]  }
 0x39a   :  { %1719 = vmatprep.subr.bf16.mxu1 %v1945_v20 }
 0x39d   :  { %1720 = vmatpush3.bf16.msra.mxu1 %v1913_v12  ;;  %v1554_v12 = vld [vmem:[%s2542_s18] ss:$0 sm:$0xff] }
 0x39e   :  { %1721 = vmatprep.subr.bf16.mxu1 %v1945_v20 }
 0x3a1   :  { %1722 = vmatpush3.bf16.msra.mxu1 %v1914_v13 }
 0x3a2   :  { %1723 = vmatprep.subr.bf16.mxu1 %v1945_v20 }
 0x3a5   :  { %1724 = vmatpush3.bf16.msra.mxu1 %v1915_v14 }
 0x3a6   :  { %1725 = vmatprep.subr.bf16.mxu1 %v1945_v20 }
 0x3a9   :  { %1726 = vmatpush3.bf16.msra.mxu1 %v1916_v15 }
 0x3aa   :  { %1727 = vmatprep.subr.bf16.mxu1 %v1945_v20 }
 0x3ad   :  { %1728 = vmatpush3.bf16.msra.mxu1 %v1917_v16 }
 0x3ae   :  { %1729 = vmatprep.subr.bf16.mxu1 %v1945_v20 }
 0x3b1   :  { %1730 = vmatpush3.bf16.msra.mxu1 %v1918_v26 }
 0x3b2   :  { %1731 = vmatprep.subr.bf16.mxu1 %v1945_v20 }
 0x3b5   :  { %1732 = vmatpush3.bf16.msra.mxu1 %v1919_v27 }
 0x3b6   :  { %1757 = vmatprep.subr.bf16.mxu1 %v1945_v20 }
 0x46b   :  { %v868_v18 = vpop.f32.mrb[4].mxu1 }
 0x46c   :  { %v869_v19 = vadd.f32 %v1518_v17, %v868_v18  ;;  %v1695_v21 = vpop.f32.mrb[5].mxu1 }
 0x46d   :  { %v871_v22 = vpop.f32.mrb[6].mxu1 }
 0x46e   :  { %v874_v23 = vmax.f32 %v869_v19, 0.0  ;;  %v1696_v24 = vpop.f32.mrb[7].mxu1 }
 0x470   :  { %v892_v25 = vpack.c.bf16 %v874_v23, %v874_v23 }
 0x472   :  { %1714 = vmatmul.mubr.bf16.vlgmr.msra.gmra.mrb[12].mxu0 %v892_v25 }
 0x473   :  { %1753 = vmatprep.mubr.msk.bf16.mxu0 %vm1946_vm0, %v1945_v20  ;;  %1738 = vmatpush3.bf16.msra.mxu0 %v1920_v28 }
 0x474   :  { %1739 = vmatprep.subr.bf16.mxu0 %v1945_v20 }
 0x477   :  { %1740 = vmatpush3.bf16.msra.mxu0 %v1921_v29 }
 0x478   :  { %1741 = vmatprep.subr.bf16.mxu0 %v1945_v20 }
 0x47b   :  { %1742 = vmatpush3.bf16.msra.mxu0 %v1922_v30 }
 0x47c   :  { %1743 = vmatprep.subr.bf16.mxu0 %v1945_v20 }
 0x47f   :  { %1744 = vmatpush3.bf16.msra.mxu0 %v1923_v31 }
 0x480   :  { %1745 = vmatprep.subr.bf16.mxu0 %v1945_v20 }
 0x483   :  { %1746 = vmatpush3.bf16.msra.mxu0 %v1924_v32 }
 0x484   :  { %1747 = vmatprep.subr.bf16.mxu0 %v1945_v20 }
 0x487   :  { %1748 = vmatpush3.bf16.msra.mxu0 %v1925_v33 }
 0x488   :  { %1749 = vmatprep.subr.bf16.mxu0 %v1945_v20 }
 0x48b   :  { %1750 = vmatpush3.bf16.msra.mxu0 %v1926_v42 }
 0x48c   :  { %1751 = vmatprep.subr.bf16.mxu0 %v1945_v20 }
 0x48f   :  { %1752 = vmatpush3.bf16.msra.mxu0 %v1927_v43 }
 0x490   :  { %1777 = vmatprep.subr.bf16.mxu0 %v1945_v20 }
 0x545   :  { %v981_v35 = vpop.f32.mrb[12].mxu0 }
 0x546   :  { %v982_v36 = vadd.f32 %v1527_v34, %v981_v35  ;;  %v1715_v37 = vpop.f32.mrb[13].mxu0 }
 0x547   :  { %v984_v38 = vpop.f32.mrb[14].mxu0 }
 0x548   :  { %v987_v39 = vmax.f32 %v982_v36, 0.0  ;;  %v1716_v40 = vpop.f32.mrb[15].mxu0 }
 0x54a   :  { %v1005_v41 = vpack.c.bf16 %v987_v39, %v987_v39 }
 0x54c   :  { %1734 = vmatmul.mubr.bf16.vlgmr.msra.gmra.mrb[8].mxu1 %v1005_v41 }
 0x54d   :  { %1773 = vmatprep.mubr.msk.bf16.mxu1 %vm1946_vm0, %v1945_v20  ;;  %1758 = vmatpush3.bf16.msra.mxu1 %v1928_v44 }
 0x54e   :  { %1759 = vmatprep.subr.bf16.mxu1 %v1945_v20 }
 0x551   :  { %1760 = vmatpush3.bf16.msra.mxu1 %v1929_v45 }
 0x552   :  { %1761 = vmatprep.subr.bf16.mxu1 %v1945_v20 }
 0x555   :  { %1762 = vmatpush3.bf16.msra.mxu1 %v1930_v46 }
 0x556   :  { %1763 = vmatprep.subr.bf16.mxu1 %v1945_v20 }
 0x559   :  { %1764 = vmatpush3.bf16.msra.mxu1 %v1931_v47 }
 0x55a   :  { %1765 = vmatprep.subr.bf16.mxu1 %v1945_v20 }
 0x55d   :  { %1766 = vmatpush3.bf16.msra.mxu1 %v1932_v48 }
 0x55e   :  { %1767 = vmatprep.subr.bf16.mxu1 %v1945_v20 }
 0x561   :  { %1768 = vmatpush3.bf16.msra.mxu1 %v1933_v49 }
 0x562   :  { %1769 = vmatprep.subr.bf16.mxu1 %v1945_v20 }
 0x565   :  { %1770 = vmatpush3.bf16.msra.mxu1 %v1934_v58 }
 0x566   :  { %1771 = vmatprep.subr.bf16.mxu1 %v1945_v20 }
 0x569   :  { %1772 = vmatpush3.bf16.msra.mxu1 %v1935_v59 }
 0x61f   :  { %v1094_v51 = vpop.f32.mrb[8].mxu1 }
 0x620   :  { %v1095_v52 = vadd.f32 %v1536_v50, %v1094_v51  ;;  %v1735_v53 = vpop.f32.mrb[9].mxu1 }
 0x621   :  { %v1097_v54 = vpop.f32.mrb[10].mxu1 }
 0x622   :  { %v1100_v55 = vmax.f32 %v1095_v52, 0.0  ;;  %v1736_v56 = vpop.f32.mrb[11].mxu1 }
 0x624   :  { %v1118_v57 = vpack.c.bf16 %v1100_v55, %v1100_v55 }
 0x626   :  { %1754 = vmatmul.mubr.bf16.vlgmr.msra.gmra.mrb[16].mxu0 %v1118_v57 }
 0x627   :  { %1793 = vmatprep.mubr.msk.bf16.mxu0 %vm1946_vm0, %v1945_v20  ;;  %1778 = vmatpush3.bf16.msra.mxu0 %v1936_v60 }
 0x628   :  { %1779 = vmatprep.subr.bf16.mxu0 %v1945_v20 }
 0x62b   :  { %1780 = vmatpush3.bf16.msra.mxu0 %v1937_v61 }
 0x62c   :  { %1781 = vmatprep.subr.bf16.mxu0 %v1945_v20 }
 0x62f   :  { %1782 = vmatpush3.bf16.msra.mxu0 %v1938_v62 }
 0x630   :  { %1783 = vmatprep.subr.bf16.mxu0 %v1945_v20 }
 0x633   :  { %1784 = vmatpush3.bf16.msra.mxu0 %v1939_v63 }
 0x634   :  { %1785 = vmatprep.subr.bf16.mxu0 %v1945_v20 }
 0x637   :  { %1786 = vmatpush3.bf16.msra.mxu0 %v1940_v0 }
 0x638   :  { %1787 = vmatprep.subr.bf16.mxu0 %v1945_v20 }
 0x63b   :  { %1788 = vmatpush3.bf16.msra.mxu0 %v1941_v1 }
 0x63c   :  { %1789 = vmatprep.subr.bf16.mxu0 %v1945_v20 }
 0x63f   :  { %1790 = vmatpush3.bf16.msra.mxu0 %v1942_v10 }
 0x640   :  { %1791 = vmatprep.subr.bf16.mxu0 %v1945_v20  ;;  %v1563_v20 = vld [vmem:[%s2543_s20] ss:$0 sm:$0xff] }
 0x643   :  { %1792 = vmatpush3.bf16.msra.mxu0 %v1943_v11 }
 0x6f9   :  { %v1207_v3 = vpop.f32.mrb[16].mxu0 }
 0x6fa   :  { %v1208_v4 = vadd.f32 %v1545_v2, %v1207_v3  ;;  %v1755_v5 = vpop.f32.mrb[17].mxu0 }
 0x6fb   :  { %v1210_v6 = vpop.f32.mrb[18].mxu0 }
 0x6fc   :  { %v1213_v7 = vmax.f32 %v1208_v4, 0.0  ;;  %v1756_v8 = vpop.f32.mrb[19].mxu0 }
 0x6fe   :  { %v1231_v9 = vpack.c.bf16 %v1213_v7, %v1213_v7 }
 0x700   :  { %1774 = vmatmul.mubr.bf16.vlgmr.msra.gmra.mrb[12].mxu1 %v1231_v9 }
 0x7d3   :  { %v1320_v13 = vpop.f32.mrb[12].mxu1 }
 0x7d4   :  { %v1321_v14 = vadd.f32 %v1554_v12, %v1320_v13  ;;  %v1775_v15 = vpop.f32.mrb[13].mxu1 }
 0x7d5   :  { %v1323_v16 = vpop.f32.mrb[14].mxu1 }
 0x7d6   :  { %v1326_v17 = vmax.f32 %v1321_v14, 0.0  ;;  %v1776_v18 = vpop.f32.mrb[15].mxu1 }
 0x7d8   :  { %v1344_v19 = vpack.c.bf16 %v1326_v17, %v1326_v17 }
 0x7da   :  { %1794 = vmatmul.mubr.bf16.vlgmr.msra.gmra.mrb[20].mxu0 %v1344_v19 }
 0x8ad   :  { %v1433_v21 = vpop.f32.mrb[20].mxu0 }
 0x8ae   :  { %v1434_v22 = vadd.f32 %v1563_v20, %v1433_v21  ;;  %v1795_v23 = vpop.f32.mrb[21].mxu0 }
 0x8af   :  { %v1436_v24 = vpop.f32.mrb[22].mxu0 }
 0x8b0   :  { %1439 = vst [vmem:[%s2544_s21] sm:$0xff] %v1434_v22  ;;  %v1796_v25 = vpop.f32.mrb[23].mxu0 }

</bundles_post_ra>
